<compile_context>
chip_gen: v6e
topology: v6e:2x2x1
jax: 0.10.0
libtpu: 0.0.40
codegen_flags: <defaults>
</compile_context>

<pallas_src>
import jax
import jax.numpy as jnp
from jax.experimental import pallas as pl
from jax.experimental.pallas import tpu as pltpu


def _round_up(x, m):
    return (x + m - 1) // m * m


def _pack_weight(w_oihw, cout_pad, cin_pad):
    """OIHW conv weight -> (cout_pad, 9*cin_pad) GEMM matrix (tap-major)."""
    co, ci, kh, kw = w_oihw.shape
    wt = jnp.transpose(w_oihw, (0, 2, 3, 1))                 # (co, kh, kw, ci)
    wt = jnp.pad(wt, ((0, cout_pad - co), (0, 0), (0, 0), (0, cin_pad - ci)))
    return wt.reshape(cout_pad, kh * kw * cin_pad).astype(jnp.float32)


def downsample_forward(x_nchw, params, *, chunk_lanes=1024):
    """relu(conv2(relu(conv1(x)))), NCHW in -> NCHW out (DownSample.forward)."""
    N, Cin, H, W = x_nchw.shape
    w1, b1, w2, b2 = params["w1"], params["b1"], params["w2"], params["b2"]
    assert w1.shape == (Cin, Cin, 3, 3) and w2.shape[1:] == (Cin, 3, 3)
    C2o = w2.shape[0]                      # stride * Cin

    # conv1 output spatial size (k=3, stride=2, pad=1)
    Ho = (H - 1) // 2 + 1
    Wo = (W - 1) // 2 + 1
    A, B = Ho + 1, Wo + 1                  # phase-image height / augmented width
    Q1 = Ho * B                            # valid part of the flat spatial axis

    Cp = _round_up(Cin, 8)                 # sublane-aligned channel counts
    C2p = _round_up(C2o, 8)

    chunk = min(chunk_lanes, _round_up(Q1, 128))   # lane-chunk (multiple of 128)
    Qp = _round_up(Q1, chunk)
    n_chunks = Qp // chunk
    L0 = _round_up(B + 1, 128)             # zero margin in the h scratch
    Lg = L0 + Qp + L0                      # scratch flat length
    Lp = _round_up(Qp + B + 1, 128)        # phase flat length

    # ---- glue: 2x2 phase decomposition of the padded input (1x bytes) ----
    xpad = jnp.pad(x_nchw.astype(jnp.float32),
                   ((0, 0), (0, Cp - Cin),
                    (1, 2 * A - 1 - H), (1, 2 * B - 1 - W)))
    ph = xpad.reshape(N, Cp, A, 2, B, 2)
    ph = jnp.transpose(ph, (0, 3, 5, 1, 2, 4)).reshape(N, 4, Cp, A * B)
    ph = jnp.pad(ph, ((0, 0), (0, 0), (0, 0), (0, Lp - A * B)))

    # validity mask over the flat augmented domain (kills fake column + tail)
    q = jnp.arange(Qp, dtype=jnp.int32)
    qmask = ((q < Q1) & (q % B != B - 1)).astype(jnp.float32).reshape(1, Qp)

    # packed GEMM weights / biases
    w1c = _pack_weight(w1, Cp, Cp)
    w2c = _pack_weight(w2, C2p, Cp)
    b1c = jnp.pad(b1.astype(jnp.float32), (0, Cp - Cin)).reshape(Cp, 1)
    b2c = jnp.pad(b2.astype(jnp.float32), (0, C2p - C2o)).reshape(C2p, 1)

    def kernel(ph_ref, qm_ref, w1_ref, b1_ref, w2_ref, b2_ref, out_ref, g_ref):
        # zero the scratch: its margins double as conv2's zero row padding
        g_ref[...] = jnp.zeros(g_ref.shape, g_ref.dtype)

        # ---- conv1 (stride 2 via phases) + bias + ReLU -> VMEM scratch ----
        for c in range(n_chunks):
            q0 = c * chunk
            taps = []
            for kh in range(3):
                for kw in range(3):
                    pi = (kh % 2) * 2 + (kw % 2)
                    s = q0 + (kh // 2) * B + (kw // 2)
                    taps.append(ph_ref[0, pi, :, s:s + chunk])
            pm = jnp.concatenate(taps, axis=0)                # (9*Cp, chunk)
            h = jnp.dot(w1_ref[...], pm, preferred_element_type=jnp.float32)
            h = jnp.maximum(h + b1_ref[...], 0.0)
            h = h * qm_ref[:, q0:q0 + chunk]                  # zero fake col/tail
            g_ref[:, L0 + q0:L0 + q0 + chunk] = h             # aligned store

        # ---- conv2 (stride 1) + bias + ReLU -> output ----
        for c in range(n_chunks):
            q0 = c * chunk
            taps = []
            for kh in range(3):
                for kw in range(3):
                    s = L0 + q0 + (kh - 1) * B + (kw - 1)
                    taps.append(g_ref[:, s:s + chunk])
            pm = jnp.concatenate(taps, axis=0)                # (9*Cp, chunk)
            y = jnp.dot(w2_ref[...], pm, preferred_element_type=jnp.float32)
            y = jnp.maximum(y + b2_ref[...], 0.0)
            out_ref[0, :, q0:q0 + chunk] = y.astype(out_ref.dtype)

    flops = 2 * N * Qp * (9 * Cp) * (Cp + C2p)
    bytes_accessed = 4 * (ph.size + qmask.size + w1c.size + w2c.size
                          + b1c.size + b2c.size + N * C2p * Qp)

    out = pl.pallas_call(
        kernel,
        out_shape=jax.ShapeDtypeStruct((N, C2p, Qp), jnp.float32),
        grid_spec=pltpu.PrefetchScalarGridSpec(
            num_scalar_prefetch=0,
            grid=(N,),
            in_specs=[
                pl.BlockSpec((1, 4, Cp, Lp), lambda n: (n, 0, 0, 0)),
                pl.BlockSpec((1, Qp), lambda n: (0, 0)),
                pl.BlockSpec((Cp, 9 * Cp), lambda n: (0, 0)),
                pl.BlockSpec((Cp, 1), lambda n: (0, 0)),
                pl.BlockSpec((C2p, 9 * Cp), lambda n: (0, 0)),
                pl.BlockSpec((C2p, 1), lambda n: (0, 0)),
            ],
            out_specs=pl.BlockSpec((1, C2p, Qp), lambda n: (n, 0, 0)),
            scratch_shapes=[pltpu.VMEM((Cp, Lg), jnp.float32)],
        ),
        compiler_params=pltpu.CompilerParams(
            dimension_semantics=("parallel",),
            vmem_limit_bytes=64 * 1024 * 1024,
        ),
        cost_estimate=pl.CostEstimate(flops=flops, transcendentals=0,
                                      bytes_accessed=bytes_accessed),
    )(ph, qmask, w1c, b1c, w2c, b2c)

    # drop channel padding, spatial tail and the fake column; stays NCHW
    out = out[:, :C2o, :Q1].reshape(N, C2o, Ho, B)[:, :, :, :Wo]
    return out.astype(x_nchw.dtype)


def init_params(key, in_channels, kernel_size=3, stride=2):
    """Deterministic synthetic init (PyTorch-style uniform fan-in bounds)."""
    k1, k2, k3, k4 = jax.random.split(key, 4)
    fan_in = in_channels * kernel_size * kernel_size
    bound = 1.0 / (fan_in ** 0.5)
    w1 = jax.random.uniform(k1, (in_channels, in_channels, kernel_size, kernel_size),
                            jnp.float32, -bound, bound)
    b1 = jax.random.uniform(k2, (in_channels,), jnp.float32, -bound, bound)
    w2 = jax.random.uniform(k3, (stride * in_channels, in_channels, kernel_size, kernel_size),
                            jnp.float32, -bound, bound)
    b2 = jax.random.uniform(k4, (stride * in_channels,), jnp.float32, -bound, bound)
    return {"w1": w1, "b1": b1, "w2": w2, "b2": b2}


def _reference_forward(x_nchw, params):
    """Pure-JAX reference (lax.conv) for correctness checking."""
    def conv_relu(x, w, b, s):
        y = jax.lax.conv_general_dilated(
            x, w, window_strides=(s, s), padding=((1, 1), (1, 1)),
            dimension_numbers=("NCHW", "OIHW", "NCHW"))
        return jax.nn.relu(y + b[None, :, None, None])

    h = conv_relu(x_nchw, params["w1"], params["b1"], 2)
    return conv_relu(h, params["w2"], params["b2"], 1)


if __name__ == "__main__":
    key = jax.random.PRNGKey(0)
    k_x, k_p = jax.random.split(key)

    N, C, H, W = 2, 4, 16, 16
    x = jax.random.normal(k_x, (N, C, H, W), dtype=jnp.float32)
    params = init_params(k_p, in_channels=C, kernel_size=3, stride=2)

    out = jax.jit(downsample_forward)(x, params)
    out = jax.block_until_ready(out)

    # Expected output: (N, 2*C, H//2, W//2) = (2, 8, 8, 8)
    assert out.shape == (N, 2 * C, H // 2, W // 2), out.shape

    ref = _reference_forward(x, params)
    assert jnp.allclose(out, ref, rtol=1e-4, atol=2e-4), \
        float(jnp.max(jnp.abs(out - ref)))

    print("KERNEL_OK")
</pallas_src>

<mosaic_0001>
module attributes {stable_mosaic.version = 11 : i64} {
  func.func @kernel(%arg0: i32, %arg1: memref<1x4x8x256xf32, #tpu.memory_space<vmem>>, %arg2: memref<1x128xf32, #tpu.memory_space<vmem>>, %arg3: memref<8x72xf32, #tpu.memory_space<vmem>>, %arg4: memref<8x1xf32, #tpu.memory_space<vmem>>, %arg5: memref<8x72xf32, #tpu.memory_space<vmem>>, %arg6: memref<8x1xf32, #tpu.memory_space<vmem>>, %arg7: memref<1x8x128xf32, #tpu.memory_space<vmem>>, %arg8: memref<8x384xf32, #tpu.memory_space<vmem>>) attributes {dimension_semantics = [#tpu.dimension_semantics<parallel>], iteration_bounds = array<i64: 2>, scalar_prefetch = 0 : i64, scratch_operands = 1 : i64, tpu.core_type = #tpu.core_type<tc>, window_params = [{transform_indices = @transform_0, window_bounds = array<i64: 1, 4, 8, 256>}, {pipeline_mode = #tpu.pipeline_mode<synchronous>, transform_indices = @transform_1, window_bounds = array<i64: 1, 128>}, {pipeline_mode = #tpu.pipeline_mode<synchronous>, transform_indices = @transform_2, window_bounds = array<i64: 8, 72>}, {pipeline_mode = #tpu.pipeline_mode<synchronous>, transform_indices = @transform_3, window_bounds = array<i64: 8, 1>}, {pipeline_mode = #tpu.pipeline_mode<synchronous>, transform_indices = @transform_4, window_bounds = array<i64: 8, 72>}, {pipeline_mode = #tpu.pipeline_mode<synchronous>, transform_indices = @transform_5, window_bounds = array<i64: 8, 1>}, {transform_indices = @transform_6, window_bounds = array<i64: 1, 8, 128>}]} {
    %cst = arith.constant 0.000000e+00 : f32
    %0 = vector.broadcast %cst : f32 to vector<8x384xf32>
    %c0 = arith.constant 0 : index
    %c0_0 = arith.constant 0 : index
    %1 = vector.load %arg8[%c0, %c0_0] : memref<8x384xf32, #tpu.memory_space<vmem>>, vector<8x384xf32>
    tpu.vector_store %arg8[%c0, %c0_0], %0 {strides = array<i32>} : memref<8x384xf32, #tpu.memory_space<vmem>>, vector<8x384xf32>,
    %c0_1 = arith.constant 0 : index
    %c0_2 = arith.constant 0 : index
    %c0_3 = arith.constant 0 : index
    %c0_4 = arith.constant 0 : index
    %2 = vector.load %arg1[%c0_1, %c0_2, %c0_3, %c0_4] : memref<1x4x8x256xf32, #tpu.memory_space<vmem>>, vector<1x1x8x128xf32>
    %3 = vector.shape_cast %2 : vector<1x1x8x128xf32> to vector<8x128xf32>
    %c0_5 = arith.constant 0 : index
    %c1 = arith.constant 1 : index
    %c0_6 = arith.constant 0 : index
    %c0_7 = arith.constant 0 : index
    %4 = vector.load %arg1[%c0_5, %c1, %c0_6, %c0_7] : memref<1x4x8x256xf32, #tpu.memory_space<vmem>>, vector<1x1x8x128xf32>
    %5 = vector.shape_cast %4 : vector<1x1x8x128xf32> to vector<8x128xf32>
    %c0_8 = arith.constant 0 : index
    %c0_9 = arith.constant 0 : index
    %c0_10 = arith.constant 0 : index
    %c1_11 = arith.constant 1 : index
    %6 = vector.load %arg1[%c0_8, %c0_9, %c0_10, %c1_11] : memref<1x4x8x256xf32, #tpu.memory_space<vmem>>, vector<1x1x8x128xf32>
    %7 = vector.shape_cast %6 : vector<1x1x8x128xf32> to vector<8x128xf32>
    %c0_12 = arith.constant 0 : index
    %c2 = arith.constant 2 : index
    %c0_13 = arith.constant 0 : index
    %c0_14 = arith.constant 0 : index
    %8 = vector.load %arg1[%c0_12, %c2, %c0_13, %c0_14] : memref<1x4x8x256xf32, #tpu.memory_space<vmem>>, vector<1x1x8x128xf32>
    %9 = vector.shape_cast %8 : vector<1x1x8x128xf32> to vector<8x128xf32>
    %c0_15 = arith.constant 0 : index
    %c3 = arith.constant 3 : index
    %c0_16 = arith.constant 0 : index
    %c0_17 = arith.constant 0 : index
    %10 = vector.load %arg1[%c0_15, %c3, %c0_16, %c0_17] : memref<1x4x8x256xf32, #tpu.memory_space<vmem>>, vector<1x1x8x128xf32>
    %11 = vector.shape_cast %10 : vector<1x1x8x128xf32> to vector<8x128xf32>
    %c0_18 = arith.constant 0 : index
    %c2_19 = arith.constant 2 : index
    %c0_20 = arith.constant 0 : index
    %c1_21 = arith.constant 1 : index
    %12 = vector.load %arg1[%c0_18, %c2_19, %c0_20, %c1_21] : memref<1x4x8x256xf32, #tpu.memory_space<vmem>>, vector<1x1x8x128xf32>
    %13 = vector.shape_cast %12 : vector<1x1x8x128xf32> to vector<8x128xf32>
    %c0_22 = arith.constant 0 : index
    %c0_23 = arith.constant 0 : index
    %c0_24 = arith.constant 0 : index
    %c9 = arith.constant 9 : index
    %14 = vector.load %arg1[%c0_22, %c0_23, %c0_24, %c9] : memref<1x4x8x256xf32, #tpu.memory_space<vmem>>, vector<1x1x8x128xf32>
    %15 = vector.shape_cast %14 : vector<1x1x8x128xf32> to vector<8x128xf32>
    %c0_25 = arith.constant 0 : index
    %c1_26 = arith.constant 1 : index
    %c0_27 = arith.constant 0 : index
    %c9_28 = arith.constant 9 : index
    %16 = vector.load %arg1[%c0_25, %c1_26, %c0_27, %c9_28] : memref<1x4x8x256xf32, #tpu.memory_space<vmem>>, vector<1x1x8x128xf32>
    %17 = vector.shape_cast %16 : vector<1x1x8x128xf32> to vector<8x128xf32>
    %c0_29 = arith.constant 0 : index
    %c0_30 = arith.constant 0 : index
    %c0_31 = arith.constant 0 : index
    %c10 = arith.constant 10 : index
    %18 = vector.load %arg1[%c0_29, %c0_30, %c0_31, %c10] : memref<1x4x8x256xf32, #tpu.memory_space<vmem>>, vector<1x1x8x128xf32>
    %19 = vector.shape_cast %18 : vector<1x1x8x128xf32> to vector<8x128xf32>
    %20 = tpu.concatenate %3, %5, %7, %9, %11, %13, %15, %17, %19 in 0 : vector<8x128xf32>, vector<8x128xf32>, vector<8x128xf32>, vector<8x128xf32>, vector<8x128xf32>, vector<8x128xf32>, vector<8x128xf32>, vector<8x128xf32>, vector<8x128xf32> -> vector<72x128xf32>
    %c0_32 = arith.constant 0 : index
    %c0_33 = arith.constant 0 : index
    %21 = vector.load %arg3[%c0_32, %c0_33] : memref<8x72xf32, #tpu.memory_space<vmem>>, vector<8x72xf32>
    %cst_34 = arith.constant dense<0.000000e+00> : vector<8x128xf32>
    %22 = tpu.matmul %21, %20, %cst_34 {dimension_numbers = #tpu.dot_dimension_numbers<[1], [0], [0], [1], [0, 0, 1, 1], [], []>} : vector<8x72xf32>, vector<72x128xf32>, vector<8x128xf32> -> vector<8x128xf32>
    %c0_35 = arith.constant 0 : index
    %c0_36 = arith.constant 0 : index
    %23 = vector.load %arg4[%c0_35, %c0_36] : memref<8x1xf32, #tpu.memory_space<vmem>>, vector<8x1xf32>
    %24 = vector.broadcast %23 : vector<8x1xf32> to vector<8x128xf32>
    %25 = arith.addf %22, %24 : vector<8x128xf32>
    %cst_37 = arith.constant 0.000000e+00 : f32
    %26 = vector.broadcast %cst_37 : f32 to vector<8x128xf32>
    %27 = arith.maximumf %25, %26 : vector<8x128xf32>
    %c0_38 = arith.constant 0 : index
    %c0_39 = arith.constant 0 : index
    %28 = vector.load %arg2[%c0_38, %c0_39] : memref<1x128xf32, #tpu.memory_space<vmem>>, vector<1x128xf32>
    %29 = vector.broadcast %28 : vector<1x128xf32> to vector<8x128xf32>
    %30 = arith.mulf %27, %29 : vector<8x128xf32>
    %c0_40 = arith.constant 0 : index
    %c128 = arith.constant 128 : index
    %31 = vector.load %arg8[%c0_40, %c128] : memref<8x384xf32, #tpu.memory_space<vmem>>, vector<8x128xf32>
    tpu.vector_store %arg8[%c0_40, %c128], %30 {strides = array<i32>} : memref<8x384xf32, #tpu.memory_space<vmem>>, vector<8x128xf32>,
    %c0_41 = arith.constant 0 : index
    %c118 = arith.constant 118 : index
    %32 = vector.load %arg8[%c0_41, %c118] : memref<8x384xf32, #tpu.memory_space<vmem>>, vector<8x128xf32>
    %c0_42 = arith.constant 0 : index
    %c119 = arith.constant 119 : index
    %33 = vector.load %arg8[%c0_42, %c119] : memref<8x384xf32, #tpu.memory_space<vmem>>, vector<8x128xf32>
    %c0_43 = arith.constant 0 : index
    %c120 = arith.constant 120 : index
    %34 = vector.load %arg8[%c0_43, %c120] : memref<8x384xf32, #tpu.memory_space<vmem>>, vector<8x128xf32>
    %c0_44 = arith.constant 0 : index
    %c127 = arith.constant 127 : index
    %35 = vector.load %arg8[%c0_44, %c127] : memref<8x384xf32, #tpu.memory_space<vmem>>, vector<8x128xf32>
    %c0_45 = arith.constant 0 : index
    %c128_46 = arith.constant 128 : index
    %36 = vector.load %arg8[%c0_45, %c128_46] : memref<8x384xf32, #tpu.memory_space<vmem>>, vector<8x128xf32>
    %c0_47 = arith.constant 0 : index
    %c129 = arith.constant 129 : index
    %37 = vector.load %arg8[%c0_47, %c129] : memref<8x384xf32, #tpu.memory_space<vmem>>, vector<8x128xf32>
    %c0_48 = arith.constant 0 : index
    %c136 = arith.constant 136 : index
    %38 = vector.load %arg8[%c0_48, %c136] : memref<8x384xf32, #tpu.memory_space<vmem>>, vector<8x128xf32>
    %c0_49 = arith.constant 0 : index
    %c137 = arith.constant 137 : index
    %39 = vector.load %arg8[%c0_49, %c137] : memref<8x384xf32, #tpu.memory_space<vmem>>, vector<8x128xf32>
    %c0_50 = arith.constant 0 : index
    %c138 = arith.constant 138 : index
    %40 = vector.load %arg8[%c0_50, %c138] : memref<8x384xf32, #tpu.memory_space<vmem>>, vector<8x128xf32>
    %41 = tpu.concatenate %32, %33, %34, %35, %36, %37, %38, %39, %40 in 0 : vector<8x128xf32>, vector<8x128xf32>, vector<8x128xf32>, vector<8x128xf32>, vector<8x128xf32>, vector<8x128xf32>, vector<8x128xf32>, vector<8x128xf32>, vector<8x128xf32> -> vector<72x128xf32>
    %c0_51 = arith.constant 0 : index
    %c0_52 = arith.constant 0 : index
    %42 = vector.load %arg5[%c0_51, %c0_52] : memref<8x72xf32, #tpu.memory_space<vmem>>, vector<8x72xf32>
    %cst_53 = arith.constant dense<0.000000e+00> : vector<8x128xf32>
    %43 = tpu.matmul %42, %41, %cst_53 {dimension_numbers = #tpu.dot_dimension_numbers<[1], [0], [0], [1], [0, 0, 1, 1], [], []>} : vector<8x72xf32>, vector<72x128xf32>, vector<8x128xf32> -> vector<8x128xf32>
    %c0_54 = arith.constant 0 : index
    %c0_55 = arith.constant 0 : index
    %44 = vector.load %arg6[%c0_54, %c0_55] : memref<8x1xf32, #tpu.memory_space<vmem>>, vector<8x1xf32>
    %45 = vector.broadcast %44 : vector<8x1xf32> to vector<8x128xf32>
    %46 = arith.addf %43, %45 : vector<8x128xf32>
    %cst_56 = arith.constant 0.000000e+00 : f32
    %47 = vector.broadcast %cst_56 : f32 to vector<8x128xf32>
    %48 = arith.maximumf %46, %47 : vector<8x128xf32>
    %c0_57 = arith.constant 0 : index
    %c0_58 = arith.constant 0 : index
    %c0_59 = arith.constant 0 : index
    %49 = vector.load %arg7[%c0_57, %c0_58, %c0_59] : memref<1x8x128xf32, #tpu.memory_space<vmem>>, vector<1x8x128xf32>
    %50 = vector.shape_cast %49 : vector<1x8x128xf32> to vector<8x128xf32>
    %51 = vector.shape_cast %48 : vector<8x128xf32> to vector<1x8x128xf32>
    tpu.vector_store %arg7[%c0_57, %c0_58, %c0_59], %51 {strides = array<i32>} : memref<1x8x128xf32, #tpu.memory_space<vmem>>, vector<1x8x128xf32>,
    return
  }
  func.func @transform_0(%arg0: i32) -> (i32, i32, i32, i32) {
    %c0_i32 = arith.constant 0 : i32
    %c0_i32_0 = arith.constant 0 : i32
    %c0_i32_1 = arith.constant 0 : i32
    %c0_i32_2 = arith.constant 0 : i32
    return %arg0, %c0_i32, %c0_i32_0, %c0_i32_1 : i32, i32, i32, i32
  }
  func.func @transform_1(%arg0: i32) -> (i32, i32) {
    %c0_i32 = arith.constant 0 : i32
    %c0_i32_0 = arith.constant 0 : i32
    %c0_i32_1 = arith.constant 0 : i32
    return %c0_i32, %c0_i32_0 : i32, i32
  }
  func.func @transform_2(%arg0: i32) -> (i32, i32) {
    %c0_i32 = arith.constant 0 : i32
    %c0_i32_0 = arith.constant 0 : i32
    %c0_i32_1 = arith.constant 0 : i32
    return %c0_i32, %c0_i32_0 : i32, i32
  }
  func.func @transform_3(%arg0: i32) -> (i32, i32) {
    %c0_i32 = arith.constant 0 : i32
    %c0_i32_0 = arith.constant 0 : i32
    %c0_i32_1 = arith.constant 0 : i32
    return %c0_i32, %c0_i32_0 : i32, i32
  }
  func.func @transform_4(%arg0: i32) -> (i32, i32) {
    %c0_i32 = arith.constant 0 : i32
    %c0_i32_0 = arith.constant 0 : i32
    %c0_i32_1 = arith.constant 0 : i32
    return %c0_i32, %c0_i32_0 : i32, i32
  }
  func.func @transform_5(%arg0: i32) -> (i32, i32) {
    %c0_i32 = arith.constant 0 : i32
    %c0_i32_0 = arith.constant 0 : i32
    %c0_i32_1 = arith.constant 0 : i32
    return %c0_i32, %c0_i32_0 : i32, i32
  }
  func.func @transform_6(%arg0: i32) -> (i32, i32, i32) {
    %c0_i32 = arith.constant 0 : i32
    %c0_i32_0 = arith.constant 0 : i32
    %c0_i32_1 = arith.constant 0 : i32
    return %arg0, %c0_i32, %c0_i32_0 : i32, i32, i32
  }
}

</mosaic_0001>

<bundles_post_ra>
// kernel: downsample_forward.1
= control target key start
LH: loop header
LB: loop body
LE: loop exit
PB: predicated region body
PF: predicated region fallthrough
CT: control target
= control target key end

     0   :  { %s787_s21 = smov 0   ;;  %s922_s0 = inlined_call_operand.vmem [shape: f32[2,4,8,256], index: 0, kind: input, shape index: {}]   ;;  %s923_s1 = inlined_call_operand.vmem [shape: f32[1,128], index: 1, kind: input, shape index: {}]   ;;  %s924_s2 = inlined_call_operand.vmem [shape: f32[8,72], index: 2, kind: input, shape index: {}]   ;;  %s925_s3 = inlined_call_operand.vmem [shape: f32[8,1], index: 3, kind: input, shape index: {}]   ;;  %s926_s4 = inlined_call_operand.vmem [shape: f32[8,72], index: 4, kind: input, shape index: {}]   ;;  %s927_s5 = inlined_call_operand.vmem [shape: f32[8,1], index: 5, kind: input, shape index: {}]   ;;  %s928_s6 = inlined_call_operand.vmem [shape: f32[2,8,128], index: 6, kind: output, shape index: {}]  }
   0x1 LB: > { %s630_s22 = sadd.s32 4294967295, %s738_s21   ;;  %p634_p0 = scmp.ge.s32.totalorder %s738_s21, 1  ;;  %s738_s21 = sphi %s787_s21, %s16_s21  }
   0x2   : > { %p212_p1 = scmp.lt.s32.totalorder %s738_s21, 3 }
   0x4   : > { %p213_p2 = pnand %p634_p0, %p212_p1 }
   0x5   : > { %p241_p3 = scmp.lt.s32.totalorder (!%p213_p2), %s630_s22, 1  ;;  %s741_s27 = smov (!%p213_p2), 119  }
   0x6   : > { %216 = sbr.rel (%p213_p2) target bundleno = 815 (0x32f), region = 44  ;;  %s742_s28 = smov (!%p213_p2), 118  }
   0x7   : > { %s744_s29 = smov (!%p213_p2), 127   ;;  %s746_s8 = smov (!%p213_p2), 108  }
   0x8   : > { %s747_s9 = smov (!%p213_p2), 109   ;;  %s748_s12 = smov (!%p213_p2), 110  }
   0x9   : > { %s749_s15 = smov (!%p213_p2), 117   ;;  %s750_s16 = smov (!%p213_p2), 126  }
   0xa   : > { %s751_s17 = smov (!%p213_p2), 10  }
   0xb   : > { %v740_v0 = vmov 0.0   ;;  %s930_s22 = smov (!%p241_p3, %s630_s22), 1  ;;  %vm743_vm0 = vmmov 0   ;;  %v745_v7 = vmov 0   ;;  %v303_v8 = vld [vmem:[%s925_s3] sm:$0xff]  ;;  %vm299_vm1 = vcmask 965632  }
   0xc   : > { %669 = vmatprep.subr.mxu0 %v740_v0  ;;  %690 = vmatprep.subr.mxu1 %v740_v0  ;;  %s648_s23 = sshll.u32 %s930_s22, 6  ;;  %vm284_vm2 = vcmask 973824   ;;  %vm269_vm3 = vcmask 1039360   ;;  %v302_v25 = vld [vmem:[%s924_s2] sm:$0xff]  ;;  %vm309_vm4 = vcmask 588800   ;;  %vm441_vm5 = vcmask 883712  }
   0xd   : > { %s803_s26 = scalar_lea.vmem %s922_s0, %s648_s23  ;;  %687 = vmatprep.mubr.msk.f32.mxu0 %vm743_vm0, %v740_v0  ;;  %708 = vmatprep.mubr.msk.f32.mxu1 %vm743_vm0, %v740_v0  ;;  %v644_v29 = vld [vmem:[%s923_s1] ss:$0 sm:$0xff]  ;;  %vm435_vm6 = vcmask 891904   ;;  %vm429_vm7 = vcmask 900096   ;;  %vm423_vm8 = vcmask 957440   ;;  %vm408_vm9 = vcmask 1031168  }
   0xe   : > { %v806_v1 = vld [vmem:[%s803_s26 + $0x10] sm:$0xff]  ;;  %v809_v2 = vld [vmem:[%s803_s26] sm:$0xff]  ;;  %v642_v3 = vld [vmem:[%s803_s26 + $0x18] sm:$0xff]  ;;  %731 = vset.pattern.permute.xlu0 %v745_v7  ;;  %vm484_vm10 = vcmask 80896   ;;  %s637_s24 = sshll.u32 %s930_s22, 3 }
   0xf   : > { %289 = vrot.lane.b32.xlu1 %v806_v1, %s741_s27  ;;  %295 = vrot.lane.b32.xlu0 %v809_v2, %s742_s28  ;;  %v256_v4 = vld [vmem:[%s803_s26 + $0x8] sm:$0xff]  ;;  %v639_v6 = vld [vmem:[%s803_s26 + $0x20] sm:$0xff] }
  0x10   : > { %v641_v5 = vld [vmem:[%s803_s26 + $0x28] sm:$0xff]  ;;  %v640_v21 = vld [vmem:[%s803_s26 + $0x30] sm:$0xff]  ;;  %v444_v55 = vld [vmem:[%s927_s5] sm:$0xff] }
  0x13   : > { %291 = vrot.lane.b32.xlu1 %v642_v3, %s741_s27  ;;  %297 = vrot.lane.b32.xlu0 %v256_v4, %s742_s28 }
  0x17   : > { %282 = vrot.lane.b32.xlu1 %v256_v4, %s741_s27  ;;  %280 = vrot.lane.b32.xlu0 %v809_v2, %s741_s27 }
  0x1b   : > { %276 = vrot.lane.b32.xlu1 %v641_v5, %s744_s29  ;;  %274 = vrot.lane.b32.xlu0 %v639_v6, %s744_s29 }
  0x1f   : > { %267 = vrot.lane.b32.xlu1 %v256_v4, %s744_s29  ;;  %265 = vrot.lane.b32.xlu0 %v809_v2, %s744_s29 }
  0x23   : > { %306 = vperm.xlu0 %731, %v303_v8   ;;  %439 = vrot.lane.b32.xlu1 %v740_v0, %s746_s8 }
  0x27   : > { %433 = vrot.lane.b32.xlu1 %v740_v0, %s747_s9  ;;  %410 = vrot.lane.b32.xlu0 %v740_v0, %s741_s27 }
  0x2b   : > { %427 = vrot.lane.b32.xlu1 %v740_v0, %s748_s12 }
  0x81   : > { %v290_v9 = vpop.permute.xlu1 %289  ;;  %v296_v10 = vpop.permute.xlu0 %295 }
  0x85   : > { %v292_v11 = vpop.permute.xlu1 %291  ;;  %v298_v12 = vpop.permute.xlu0 %297 }
  0x86   : > { %v300_v13 = vsel %vm299_vm1, %v296_v10, %v298_v12  ;;  %v293_v14 = vsel %vm284_vm2, %v290_v9, %v292_v11 }
  0x87   : > { %670 = vmatpush3.msra.mxu0 %v300_v13 }
  0x88   : > { %671 = vmatprep.subr.mxu0 %v740_v0 }
  0x89   : > { %v283_v15 = vpop.permute.xlu1 %282  ;;  %672 = vmatpush3.msra.mxu0 %v293_v14  ;;  %v281_v16 = vpop.permute.xlu0 %280 }
  0x8a   : > { %673 = vmatprep.subr.mxu0 %v740_v0  ;;  %v285_v17 = vsel %vm284_vm2, %v281_v16, %v283_v15 }
  0x8b   : > { %674 = vmatpush3.msra.mxu0 %v285_v17  ;;  %v443_v17 = vld [vmem:[%s926_s4] sm:$0xff] }
  0x8c   : > { %675 = vmatprep.subr.mxu0 %v740_v0 }
  0x8d   : > { %v277_v18 = vpop.permute.xlu1 %276  ;;  %v275_v19 = vpop.permute.xlu0 %274 }
  0x8e   : > { %v278_v20 = vsel %vm269_vm3, %v275_v19, %v277_v18 }
  0x8f   : > { %676 = vmatpush3.msra.mxu0 %v278_v20 }
  0x90   : > { %677 = vmatprep.subr.mxu0 %v740_v0 }
  0x91   : > { %678 = vmatpush3.msra.mxu0 %v640_v21  ;;  %v268_v22 = vpop.permute.xlu1 %267  ;;  %v266_v23 = vpop.permute.xlu0 %265 }
  0x92   : > { %679 = vmatprep.subr.mxu0 %v740_v0  ;;  %v270_v24 = vsel %vm269_vm3, %v266_v23, %v268_v22 }
  0x93   : > { %680 = vmatpush3.msra.mxu0 %v639_v6 }
  0x94   : > { %681 = vmatprep.subr.mxu0 %v740_v0 }
  0x95   : > { %682 = vmatpush3.msra.mxu0 %v270_v24  ;;  %v440_v33 = vpop.permute.xlu1 %439 }
  0x96   : > { %683 = vmatprep.subr.mxu0 %v740_v0 }
  0x97   : > { %684 = vmatpush3.msra.mxu0 %v806_v1 }
  0x98   : > { %685 = vmatprep.subr.mxu0 %v740_v0 }
  0x99   : > { %686 = vmatpush3.msra.mxu0 %v809_v2  ;;  %v434_v34 = vpop.permute.xlu1 %433 }
  0x9a   : > { %688 = vmatmul.mubr.msk.f32.vlgmr.msra.gmra.mxu0 %vm309_vm4, %v302_v25 }
  0x9d   : > { %v428_v35 = vpop.permute.xlu1 %427 }
  0x9e   : > { %v307_v26 = vpop.permute.xlu0 %306 }
  0xa2   : > { %v411_v36 = vpop.permute.xlu0 %410 }
 0x15a   : > { %v379_v27 = vpop.f32.mrf.mxu0 }
 0x15b   : > { %v380_v28 = vadd.f32 %v379_v27, %v307_v26 }
 0x15c   : > { %v689_v30 = vpop.f32.mrf.mxu0 }
 0x15d   : > { %v383_v31 = vmax.f32 %v380_v28, 0.0 }
 0x15f   : > { %v391_v32 = vmul.f32 %v644_v29, %v383_v31 }
 0x161   : > { %431 = vrot.lane.b32.xlu0 %v391_v32, %s747_s9  ;;  %437 = vrot.lane.b32.xlu1 %v391_v32, %s746_s8 }
 0x165   : > { %425 = vrot.lane.b32.xlu0 %v391_v32, %s748_s12  ;;  %421 = vrot.lane.b32.xlu1 %v740_v0, %s749_s15 }
 0x169   : > { %419 = vrot.lane.b32.xlu0 %v391_v32, %s749_s15  ;;  %404 = vrot.lane.b32.xlu1 %v740_v0, %s750_s16 }
 0x16d   : > { %415 = vrot.lane.b32.xlu0 %v391_v32, %s742_s28  ;;  %412 = vrot.lane.b32.xlu1 %v391_v32, %s741_s27  ;;  %s249_s27 = scalar_lea.vmem %s928_s6, %s637_s24 }
 0x171   : > { %406 = vrot.lane.b32.xlu0 %v391_v32, %s750_s16  ;;  %399 = vrot.lane.b32.xlu1 %v740_v0, %s744_s29 }
 0x175   : > { %401 = vrot.lane.b32.xlu0 %v391_v32, %s744_s29 }
 0x1d3   : > { %v438_v37 = vpop.permute.xlu1 %437  ;;  %v432_v38 = vpop.permute.xlu0 %431 }
 0x1d4   : > { %480 = vrot.lane.b32.xlu1 %v438_v37, %s751_s17  ;;  %v442_v39 = vsel %vm441_vm5, %v438_v37, %v440_v33  ;;  %v436_v42 = vsel %vm435_vm6, %v432_v38, %v434_v34 }
 0x1d5   : > { %482 = vrot.lane.b32.xlu0 %v442_v39, %s751_s17 }
 0x1d7   : > { %v422_v40 = vpop.permute.xlu1 %421  ;;  %v426_v41 = vpop.permute.xlu0 %425 }
 0x1d8   : > { %476 = vrot.lane.b32.xlu1 %v432_v38, %s751_s17  ;;  %v430_v45 = vsel %vm429_vm7, %v426_v41, %v428_v35 }
 0x1d9   : > { %478 = vrot.lane.b32.xlu0 %v436_v42, %s751_s17 }
 0x1db   : > { %v405_v43 = vpop.permute.xlu1 %404  ;;  %v420_v44 = vpop.permute.xlu0 %419 }
 0x1dc   : > { %472 = vrot.lane.b32.xlu1 %v426_v41, %s751_s17  ;;  %v424_v47 = vsel %vm423_vm8, %v420_v44, %v422_v40 }
 0x1dd   : > { %474 = vrot.lane.b32.xlu0 %v430_v45, %s751_s17 }
 0x1df   : > { %v416_v46 = vpop.permute.xlu0 %415  ;;  %v413_v48 = vpop.permute.xlu1 %412 }
 0x1e0   : > { %468 = vrot.lane.b32.xlu1 %v420_v44, %s751_s17  ;;  %v414_v50 = vsel %vm284_vm2, %v411_v36, %v413_v48 }
 0x1e1   : > { %470 = vrot.lane.b32.xlu0 %v424_v47, %s751_s17 }
 0x1e3   : > { %v407_v49 = vpop.permute.xlu0 %406  ;;  %v400_v52 = vpop.permute.xlu1 %399 }
 0x1e4   : > { %466 = vrot.lane.b32.xlu1 %v416_v46, %s751_s17  ;;  %v409_v51 = vsel %vm408_vm9, %v405_v43, %v407_v49 }
 0x1e5   : > { %462 = vrot.lane.b32.xlu0 %v414_v50, %s751_s17 }
 0x1e7   : > { %v402_v53 = vpop.permute.xlu0 %401 }
 0x1e8   : > { %464 = vrot.lane.b32.xlu1 %v413_v48, %s751_s17  ;;  %v403_v54 = vsel %vm269_vm3, %v400_v52, %v402_v53 }
 0x1e9   : > { %458 = vrot.lane.b32.xlu0 %v409_v51, %s751_s17 }
 0x1ec   : > { %460 = vrot.lane.b32.xlu1 %v407_v49, %s751_s17 }
 0x1ed   : > { %454 = vrot.lane.b32.xlu0 %v403_v54, %s751_s17 }
 0x1f0   : > { %456 = vrot.lane.b32.xlu1 %v402_v53, %s751_s17 }
 0x1f1   : > { %450 = vrot.lane.b32.xlu0 %v740_v0, %s751_s17 }
 0x1f4   : > { %452 = vrot.lane.b32.xlu1 %v391_v32, %s751_s17 }
 0x1f5   : > { %447 = vperm.xlu0 %731, %v444_v55  }
 0x246   : > { %v481_v56 = vpop.permute.xlu1 %480 }
 0x247   : > { %v483_v57 = vpop.permute.xlu0 %482 }
 0x248   : > { %v492_v58 = vsel %vm484_vm10, %v481_v56, %v483_v57 }
 0x249   : > { %691 = vmatpush3.msra.mxu1 %v492_v58 }
 0x24a   : > { %v477_v59 = vpop.permute.xlu1 %476  ;;  %692 = vmatprep.subr.mxu1 %v740_v0 }
 0x24b   : > { %v479_v60 = vpop.permute.xlu0 %478 }
 0x24c   : > { %v491_v61 = vsel %vm484_vm10, %v477_v59, %v479_v60 }
 0x24d   : > { %693 = vmatpush3.msra.mxu1 %v491_v61 }
 0x24e   : > { %v473_v62 = vpop.permute.xlu1 %472  ;;  %694 = vmatprep.subr.mxu1 %v740_v0 }
 0x24f   : > { %v475_v63 = vpop.permute.xlu0 %474 }
 0x250   : > { %v490_v1 = vsel %vm484_vm10, %v473_v62, %v475_v63 }
 0x251   : > { %695 = vmatpush3.msra.mxu1 %v490_v1 }
 0x252   : > { %v469_v2 = vpop.permute.xlu1 %468  ;;  %696 = vmatprep.subr.mxu1 %v740_v0 }
 0x253   : > { %v471_v3 = vpop.permute.xlu0 %470 }
 0x254   : > { %v489_v4 = vsel %vm484_vm10, %v469_v2, %v471_v3 }
 0x255   : > { %697 = vmatpush3.msra.mxu1 %v489_v4 }
 0x256   : > { %v467_v5 = vpop.permute.xlu1 %466  ;;  %698 = vmatprep.subr.mxu1 %v740_v0 }
 0x257   : > { %699 = vmatpush3.msra.mxu1 %v467_v5  ;;  %v463_v6 = vpop.permute.xlu0 %462 }
 0x258   : > { %700 = vmatprep.subr.mxu1 %v740_v0 }
 0x25a   : > { %v465_v7 = vpop.permute.xlu1 %464 }
 0x25b   : > { %v459_v8 = vpop.permute.xlu0 %458  ;;  %v488_v9 = vsel %vm484_vm10, %v463_v6, %v465_v7 }
 0x25c   : > { %701 = vmatpush3.msra.mxu1 %v488_v9 }
 0x25d   : > { %702 = vmatprep.subr.mxu1 %v740_v0 }
 0x25e   : > { %v461_v10 = vpop.permute.xlu1 %460 }
 0x25f   : > { %v487_v11 = vsel %vm484_vm10, %v459_v8, %v461_v10  ;;  %v455_v12 = vpop.permute.xlu0 %454 }
 0x260   : > { %703 = vmatpush3.msra.mxu1 %v487_v11 }
 0x261   : > { %704 = vmatprep.subr.mxu1 %v740_v0 }
 0x262   : > { %v457_v13 = vpop.permute.xlu1 %456 }
 0x263   : > { %v486_v14 = vsel %vm484_vm10, %v455_v12, %v457_v13  ;;  %v451_v15 = vpop.permute.xlu0 %450 }
 0x264   : > { %705 = vmatpush3.msra.mxu1 %v486_v14 }
 0x265   : > { %706 = vmatprep.subr.mxu1 %v740_v0 }
 0x266   : > { %v453_v16 = vpop.permute.xlu1 %452 }
 0x267   : > { %v485_v18 = vsel %vm484_vm10, %v451_v15, %v453_v16 }
 0x268   : > { %707 = vmatpush3.msra.mxu1 %v485_v18 }
 0x269   : > { %709 = vmatmul.mubr.msk.f32.vlgmr.msra.gmra.mxu1 %vm309_vm4, %v443_v17 }
 0x270   : > { %v448_v19 = vpop.permute.xlu0 %447 }
 0x329   : > { %v571_v20 = vpop.f32.mrf.mxu1 }
 0x32a   : > { %v572_v21 = vadd.f32 %v571_v20, %v448_v19 }
 0x32b   : > { %v710_v22 = vpop.f32.mrf.mxu1 }
 0x32c   : > { %v575_v0 = vmax.f32 %v572_v21, 0.0 }
 0x32e   : > { %576 = vst [vmem:[%s249_s27] sm:$0xff] %v575_v0 }
 0x32f PF: > { %s16_s21 = sadd.s32 1, %s738_s21  }
 0x330   : > { %p13_p4 = scmp.ge.s32.totalorder %s16_s21, 4  }
 0x332   :  { %15 = sbr.rel (!%p13_p4) target bundleno = 1 (0x1), region = 77 }

</bundles_post_ra>
